<compile_context>
chip_gen: v7x
topology: tpu7x:2x2x1
jax: 0.10.0
libtpu: 0.0.40
codegen_flags: <defaults>
</compile_context>

<pallas_src>
import jax
import jax.numpy as jnp
from jax.experimental import pallas as pl
from jax.experimental.pallas import tpu as pltpu

B_GROUP = 8    # rows per independent batch (>=2 required for training-mode BN)
G = 4          # number of independent batches fused into one kernel launch
IN = 20        # input_size
HID = 100      # hidden width
OUT = 1        # output_size
PAD = 128      # lane-padded feature width
EPS = 1e-5
LEAKY_SLOPE = 0.01


def portfolio_kernel(x_ref, w_ref, v_ref, o_ref):
    """Per-grid-step refs:
         x_ref: (B_GROUP, 128)  one independent batch, lane-padded
         w_ref: (3, 128, 128)   weight slab, grid-resident (same block every step)
         v_ref: (8, 128)        rows 0..5 = g1, be1, g2, be2, g3, be3
         o_ref: (B_GROUP, 128)  lane-dense output (column 0 is the real output)
    """
    inv_b = jnp.float32(1.0 / B_GROUP)

    def bn_train(h, g, be):
        # Training-mode BatchNorm1d over this group's batch axis, biased variance.
        # Two-pass (centered) variance -- numerically matches the reference.
        mean = jnp.sum(h, axis=0, keepdims=True) * inv_b
        d = h - mean
        var = jnp.sum(d * d, axis=0, keepdims=True) * inv_b
        scale = g * jax.lax.rsqrt(var + EPS)   # gamma = 0 on padded lanes -> stays 0
        return d * scale + be

    x = x_ref[...]

    # Block 1: Linear (bias absorbed by BN mean subtraction) -> BN -> LeakyReLU
    h = jnp.dot(x, w_ref[0], preferred_element_type=jnp.float32)
    h = bn_train(h, v_ref[0:1, :], v_ref[1:2, :])
    h = jnp.maximum(h, LEAKY_SLOPE * h)

    # Block 2
    h = jnp.dot(h, w_ref[1], preferred_element_type=jnp.float32)
    h = bn_train(h, v_ref[2:3, :], v_ref[3:4, :])
    h = jnp.maximum(h, LEAKY_SLOPE * h)

    # Block 3: Linear -> BN -> Sigmoid
    h = jnp.dot(h, w_ref[2], preferred_element_type=jnp.float32)
    h = bn_train(h, v_ref[4:5, :], v_ref[5:6, :])
    h = jax.nn.sigmoid(h)

    o_ref[...] = (h - 0.5) * 0.1


def init_params(key):
    ks = jax.random.split(key, 6)

    def linear(kw, kb, fan_in, fan_out):
        bound = 1.0 / jnp.sqrt(fan_in)
        w = jax.random.uniform(kw, (fan_in, fan_out), jnp.float32, -bound, bound)
        b = jax.random.uniform(kb, (fan_out,), jnp.float32, -bound, bound)
        return w, b

    w1, b1 = linear(ks[0], ks[1], IN, HID)
    w2, b2 = linear(ks[2], ks[3], HID, HID)
    w3, b3 = linear(ks[4], ks[5], HID, OUT)
    # BatchNorm affine params: gamma=1, beta=0 (PyTorch default init)
    g1, be1 = jnp.ones((HID,), jnp.float32), jnp.zeros((HID,), jnp.float32)
    g2, be2 = jnp.ones((HID,), jnp.float32), jnp.zeros((HID,), jnp.float32)
    g3, be3 = jnp.ones((OUT,), jnp.float32), jnp.zeros((OUT,), jnp.float32)
    return dict(w1=w1, b1=b1, g1=g1, be1=be1,
                w2=w2, b2=b2, g2=g2, be2=be2,
                w3=w3, b3=b3, g3=g3, be3=be3)


def prepare_params(p):
    """One-time padding into two lane-dense slabs (hoisted out of the hot path).

    Linear biases are intentionally omitted: training-mode BN removes them exactly.
    """
    w1 = jnp.pad(p["w1"].astype(jnp.float32), ((0, PAD - IN), (0, PAD - HID)))
    w2 = jnp.pad(p["w2"].astype(jnp.float32), ((0, PAD - HID), (0, PAD - HID)))
    w3 = jnp.pad(p["w3"].astype(jnp.float32), ((0, PAD - HID), (0, PAD - OUT)))
    W = jnp.stack([w1, w2, w3])                       # (3, 128, 128)

    def padv(v, n):
        return jnp.pad(v.astype(jnp.float32), (0, PAD - n))

    zeros = jnp.zeros((PAD,), jnp.float32)
    V = jnp.stack([padv(p["g1"], HID), padv(p["be1"], HID),
                   padv(p["g2"], HID), padv(p["be2"], HID),
                   padv(p["g3"], OUT), padv(p["be3"], OUT),
                   zeros, zeros])                     # (8, 128) sublane-aligned
    return W, V


def prepare_input(x):
    """One-time lane padding of the stacked (G*B_GROUP, IN) input (outside hot path)."""
    return jnp.pad(x.astype(jnp.float32), ((0, 0), (0, PAD - IN)))


@jax.jit
def portfolio_forward(xp, W, V):
    """xp: (G*B_GROUP, PAD) pre-padded stacked input -> (G*B_GROUP, PAD) lane-dense out."""
    g = xp.shape[0] // B_GROUP
    flops = g * 3 * 2 * B_GROUP * PAD * PAD
    bytes_accessed = 4 * (2 * xp.size + W.size + V.size)
    return pl.pallas_call(
        portfolio_kernel,
        out_shape=jax.ShapeDtypeStruct((g * B_GROUP, PAD), jnp.float32),
        grid=(g,),
        in_specs=[
            pl.BlockSpec((B_GROUP, PAD), lambda i: (i, 0)),    # per-group x tile
            pl.BlockSpec((3, PAD, PAD), lambda i: (0, 0, 0)),  # W: constant index -> VMEM-resident
            pl.BlockSpec((8, PAD), lambda i: (0, 0)),          # V: constant index -> VMEM-resident
        ],
        out_specs=pl.BlockSpec((B_GROUP, PAD), lambda i: (i, 0)),
        compiler_params=pltpu.CompilerParams(
            dimension_semantics=("parallel",)),
        cost_estimate=pl.CostEstimate(
            flops=flops,
            transcendentals=g * B_GROUP * PAD,
            bytes_accessed=bytes_accessed),
    )(xp, W, V)


def portfolio_forward_ref(x, p):
    # Pure-JAX reference matching PyTorch semantics for ONE batch (biases included).
    def bn(h, g, be):
        mean = jnp.mean(h, axis=0, keepdims=True)
        var = jnp.mean((h - mean) ** 2, axis=0, keepdims=True)
        return g * (h - mean) / jnp.sqrt(var + EPS) + be

    h = x @ p["w1"] + p["b1"]
    h = bn(h, p["g1"], p["be1"])
    h = jnp.where(h > 0, h, LEAKY_SLOPE * h)
    h = h @ p["w2"] + p["b2"]
    h = bn(h, p["g2"], p["be2"])
    h = jnp.where(h > 0, h, LEAKY_SLOPE * h)
    h = h @ p["w3"] + p["b3"]
    h = bn(h, p["g3"], p["be3"])
    h = jax.nn.sigmoid(h)
    return (h - 0.5) * 0.1


if __name__ == "__main__":
    key = jax.random.PRNGKey(0)
    kx, kp = jax.random.split(key)
    # G independent 8-row batches, stacked: (G*8, IN)
    x = jax.random.normal(kx, (G * B_GROUP, IN), jnp.float32)
    params = init_params(kp)

    # One-time padding, outside the hot path.
    W, V = prepare_params(params)
    xp = prepare_input(x)
    W = jax.block_until_ready(W)
    V = jax.block_until_ready(V)
    xp = jax.block_until_ready(xp)

    out = portfolio_forward(xp, W, V)          # (G*8, 128) lane-dense
    out = jax.block_until_ready(out)
    y = out[:, :OUT]                           # (G*8, 1)

    # Reference: the PyTorch model applied independently to each 8-row batch.
    y_ref = jax.vmap(lambda xg: portfolio_forward_ref(xg, params))(
        x.reshape(G, B_GROUP, IN)).reshape(G * B_GROUP, OUT)

    assert y.shape == (G * B_GROUP, OUT), y.shape
    assert jnp.allclose(y, y_ref, atol=1e-5, rtol=1e-5), jnp.max(jnp.abs(y - y_ref))
    print("KERNEL_OK")
</pallas_src>

<mosaic_0001>
module attributes {stable_mosaic.version = 11 : i64} {
  func.func @portfolio_kernel(%arg0: i32, %arg1: memref<8x128xf32, #tpu.memory_space<vmem>>, %arg2: memref<3x128x128xf32, #tpu.memory_space<vmem>>, %arg3: memref<8x128xf32, #tpu.memory_space<vmem>>, %arg4: memref<8x128xf32, #tpu.memory_space<vmem>>) attributes {dimension_semantics = [#tpu.dimension_semantics<parallel>], iteration_bounds = array<i64: 4>, scalar_prefetch = 0 : i64, scratch_operands = 0 : i64, tpu.core_type = #tpu.core_type<tc>, window_params = [{transform_indices = @transform_0, window_bounds = array<i64: 8, 128>}, {pipeline_mode = #tpu.pipeline_mode<synchronous>, transform_indices = @transform_1, window_bounds = array<i64: 3, 128, 128>}, {pipeline_mode = #tpu.pipeline_mode<synchronous>, transform_indices = @transform_2, window_bounds = array<i64: 8, 128>}, {transform_indices = @transform_3, window_bounds = array<i64: 8, 128>}]} {
    %c0 = arith.constant 0 : index
    %c0_0 = arith.constant 0 : index
    %0 = vector.load %arg1[%c0, %c0_0] : memref<8x128xf32, #tpu.memory_space<vmem>>, vector<8x128xf32>
    %c0_1 = arith.constant 0 : index
    %c0_2 = arith.constant 0 : index
    %c0_3 = arith.constant 0 : index
    %1 = vector.load %arg2[%c0_1, %c0_2, %c0_3] : memref<3x128x128xf32, #tpu.memory_space<vmem>>, vector<1x128x128xf32>
    %2 = vector.shape_cast %1 : vector<1x128x128xf32> to vector<128x128xf32>
    %cst = arith.constant dense<0.000000e+00> : vector<8x128xf32>
    %3 = tpu.matmul %0, %2, %cst {dimension_numbers = #tpu.dot_dimension_numbers<[1], [0], [0], [1], [0, 0, 1, 1], [], []>} : vector<8x128xf32>, vector<128x128xf32>, vector<8x128xf32> -> vector<8x128xf32>
    %c0_4 = arith.constant 0 : index
    %c0_5 = arith.constant 0 : index
    %4 = vector.load %arg3[%c0_4, %c0_5] : memref<8x128xf32, #tpu.memory_space<vmem>>, vector<1x128xf32>
    %c1 = arith.constant 1 : index
    %c0_6 = arith.constant 0 : index
    %5 = vector.load %arg3[%c1, %c0_6] : memref<8x128xf32, #tpu.memory_space<vmem>>, vector<1x128xf32>
    %cst_7 = arith.constant dense<0.000000e+00> : vector<128xf32>
    %6 = vector.multi_reduction <add>, %3, %cst_7 [0] : vector<8x128xf32> to vector<128xf32>
    %7 = vector.shape_cast %6 : vector<128xf32> to vector<1x128xf32>
    %cst_8 = arith.constant 1.250000e-01 : f32
    %8 = vector.broadcast %cst_8 : f32 to vector<1x128xf32>
    %9 = arith.mulf %7, %8 : vector<1x128xf32>
    %10 = vector.broadcast %9 : vector<1x128xf32> to vector<8x128xf32>
    %11 = arith.subf %3, %10 : vector<8x128xf32>
    %12 = arith.mulf %11, %11 : vector<8x128xf32>
    %cst_9 = arith.constant dense<0.000000e+00> : vector<128xf32>
    %13 = vector.multi_reduction <add>, %12, %cst_9 [0] : vector<8x128xf32> to vector<128xf32>
    %14 = vector.shape_cast %13 : vector<128xf32> to vector<1x128xf32>
    %cst_10 = arith.constant 1.250000e-01 : f32
    %15 = vector.broadcast %cst_10 : f32 to vector<1x128xf32>
    %16 = arith.mulf %14, %15 : vector<1x128xf32>
    %cst_11 = arith.constant 9.99999974E-6 : f32
    %17 = vector.broadcast %cst_11 : f32 to vector<1x128xf32>
    %18 = arith.addf %16, %17 : vector<1x128xf32>
    %19 = math.rsqrt %18 : vector<1x128xf32>
    %20 = arith.mulf %4, %19 : vector<1x128xf32>
    %21 = vector.broadcast %20 : vector<1x128xf32> to vector<8x128xf32>
    %22 = arith.mulf %11, %21 : vector<8x128xf32>
    %23 = vector.broadcast %5 : vector<1x128xf32> to vector<8x128xf32>
    %24 = arith.addf %22, %23 : vector<8x128xf32>
    %cst_12 = arith.constant 0.00999999977 : f32
    %25 = vector.broadcast %cst_12 : f32 to vector<8x128xf32>
    %26 = arith.mulf %25, %24 : vector<8x128xf32>
    %27 = arith.maximumf %24, %26 : vector<8x128xf32>
    %c1_13 = arith.constant 1 : index
    %c0_14 = arith.constant 0 : index
    %c0_15 = arith.constant 0 : index
    %28 = vector.load %arg2[%c1_13, %c0_14, %c0_15] : memref<3x128x128xf32, #tpu.memory_space<vmem>>, vector<1x128x128xf32>
    %29 = vector.shape_cast %28 : vector<1x128x128xf32> to vector<128x128xf32>
    %cst_16 = arith.constant dense<0.000000e+00> : vector<8x128xf32>
    %30 = tpu.matmul %27, %29, %cst_16 {dimension_numbers = #tpu.dot_dimension_numbers<[1], [0], [0], [1], [0, 0, 1, 1], [], []>} : vector<8x128xf32>, vector<128x128xf32>, vector<8x128xf32> -> vector<8x128xf32>
    %c2 = arith.constant 2 : index
    %c0_17 = arith.constant 0 : index
    %31 = vector.load %arg3[%c2, %c0_17] : memref<8x128xf32, #tpu.memory_space<vmem>>, vector<1x128xf32>
    %c3 = arith.constant 3 : index
    %c0_18 = arith.constant 0 : index
    %32 = vector.load %arg3[%c3, %c0_18] : memref<8x128xf32, #tpu.memory_space<vmem>>, vector<1x128xf32>
    %cst_19 = arith.constant dense<0.000000e+00> : vector<128xf32>
    %33 = vector.multi_reduction <add>, %30, %cst_19 [0] : vector<8x128xf32> to vector<128xf32>
    %34 = vector.shape_cast %33 : vector<128xf32> to vector<1x128xf32>
    %cst_20 = arith.constant 1.250000e-01 : f32
    %35 = vector.broadcast %cst_20 : f32 to vector<1x128xf32>
    %36 = arith.mulf %34, %35 : vector<1x128xf32>
    %37 = vector.broadcast %36 : vector<1x128xf32> to vector<8x128xf32>
    %38 = arith.subf %30, %37 : vector<8x128xf32>
    %39 = arith.mulf %38, %38 : vector<8x128xf32>
    %cst_21 = arith.constant dense<0.000000e+00> : vector<128xf32>
    %40 = vector.multi_reduction <add>, %39, %cst_21 [0] : vector<8x128xf32> to vector<128xf32>
    %41 = vector.shape_cast %40 : vector<128xf32> to vector<1x128xf32>
    %cst_22 = arith.constant 1.250000e-01 : f32
    %42 = vector.broadcast %cst_22 : f32 to vector<1x128xf32>
    %43 = arith.mulf %41, %42 : vector<1x128xf32>
    %cst_23 = arith.constant 9.99999974E-6 : f32
    %44 = vector.broadcast %cst_23 : f32 to vector<1x128xf32>
    %45 = arith.addf %43, %44 : vector<1x128xf32>
    %46 = math.rsqrt %45 : vector<1x128xf32>
    %47 = arith.mulf %31, %46 : vector<1x128xf32>
    %48 = vector.broadcast %47 : vector<1x128xf32> to vector<8x128xf32>
    %49 = arith.mulf %38, %48 : vector<8x128xf32>
    %50 = vector.broadcast %32 : vector<1x128xf32> to vector<8x128xf32>
    %51 = arith.addf %49, %50 : vector<8x128xf32>
    %cst_24 = arith.constant 0.00999999977 : f32
    %52 = vector.broadcast %cst_24 : f32 to vector<8x128xf32>
    %53 = arith.mulf %52, %51 : vector<8x128xf32>
    %54 = arith.maximumf %51, %53 : vector<8x128xf32>
    %c2_25 = arith.constant 2 : index
    %c0_26 = arith.constant 0 : index
    %c0_27 = arith.constant 0 : index
    %55 = vector.load %arg2[%c2_25, %c0_26, %c0_27] : memref<3x128x128xf32, #tpu.memory_space<vmem>>, vector<1x128x128xf32>
    %56 = vector.shape_cast %55 : vector<1x128x128xf32> to vector<128x128xf32>
    %cst_28 = arith.constant dense<0.000000e+00> : vector<8x128xf32>
    %57 = tpu.matmul %54, %56, %cst_28 {dimension_numbers = #tpu.dot_dimension_numbers<[1], [0], [0], [1], [0, 0, 1, 1], [], []>} : vector<8x128xf32>, vector<128x128xf32>, vector<8x128xf32> -> vector<8x128xf32>
    %c4 = arith.constant 4 : index
    %c0_29 = arith.constant 0 : index
    %58 = vector.load %arg3[%c4, %c0_29] : memref<8x128xf32, #tpu.memory_space<vmem>>, vector<1x128xf32>
    %c5 = arith.constant 5 : index
    %c0_30 = arith.constant 0 : index
    %59 = vector.load %arg3[%c5, %c0_30] : memref<8x128xf32, #tpu.memory_space<vmem>>, vector<1x128xf32>
    %cst_31 = arith.constant dense<0.000000e+00> : vector<128xf32>
    %60 = vector.multi_reduction <add>, %57, %cst_31 [0] : vector<8x128xf32> to vector<128xf32>
    %61 = vector.shape_cast %60 : vector<128xf32> to vector<1x128xf32>
    %cst_32 = arith.constant 1.250000e-01 : f32
    %62 = vector.broadcast %cst_32 : f32 to vector<1x128xf32>
    %63 = arith.mulf %61, %62 : vector<1x128xf32>
    %64 = vector.broadcast %63 : vector<1x128xf32> to vector<8x128xf32>
    %65 = arith.subf %57, %64 : vector<8x128xf32>
    %66 = arith.mulf %65, %65 : vector<8x128xf32>
    %cst_33 = arith.constant dense<0.000000e+00> : vector<128xf32>
    %67 = vector.multi_reduction <add>, %66, %cst_33 [0] : vector<8x128xf32> to vector<128xf32>
    %68 = vector.shape_cast %67 : vector<128xf32> to vector<1x128xf32>
    %cst_34 = arith.constant 1.250000e-01 : f32
    %69 = vector.broadcast %cst_34 : f32 to vector<1x128xf32>
    %70 = arith.mulf %68, %69 : vector<1x128xf32>
    %cst_35 = arith.constant 9.99999974E-6 : f32
    %71 = vector.broadcast %cst_35 : f32 to vector<1x128xf32>
    %72 = arith.addf %70, %71 : vector<1x128xf32>
    %73 = math.rsqrt %72 : vector<1x128xf32>
    %74 = arith.mulf %58, %73 : vector<1x128xf32>
    %75 = vector.broadcast %74 : vector<1x128xf32> to vector<8x128xf32>
    %76 = arith.mulf %65, %75 : vector<8x128xf32>
    %77 = vector.broadcast %59 : vector<1x128xf32> to vector<8x128xf32>
    %78 = arith.addf %76, %77 : vector<8x128xf32>
    %79 = arith.negf %78 : vector<8x128xf32>
    %80 = math.exp %79 : vector<8x128xf32>
    %cst_36 = arith.constant 1.000000e+00 : f32
    %81 = vector.broadcast %cst_36 : f32 to vector<8x128xf32>
    %82 = arith.addf %81, %80 : vector<8x128xf32>
    %83 = arith.divf %81, %82 : vector<8x128xf32>
    %cst_37 = arith.constant 5.000000e-01 : f32
    %84 = vector.broadcast %cst_37 : f32 to vector<8x128xf32>
    %85 = arith.subf %83, %84 : vector<8x128xf32>
    %cst_38 = arith.constant 1.000000e-01 : f32
    %86 = vector.broadcast %cst_38 : f32 to vector<8x128xf32>
    %87 = arith.mulf %85, %86 : vector<8x128xf32>
    %c0_39 = arith.constant 0 : index
    %c0_40 = arith.constant 0 : index
    %88 = vector.load %arg4[%c0_39, %c0_40] : memref<8x128xf32, #tpu.memory_space<vmem>>, vector<8x128xf32>
    tpu.vector_store %arg4[%c0_39, %c0_40], %87 {strides = array<i32>} : memref<8x128xf32, #tpu.memory_space<vmem>>, vector<8x128xf32>,
    return
  }
  func.func @transform_0(%arg0: i32) -> (i32, i32) {
    %c0_i32 = arith.constant 0 : i32
    %c0_i32_0 = arith.constant 0 : i32
    return %arg0, %c0_i32 : i32, i32
  }
  func.func @transform_1(%arg0: i32) -> (i32, i32, i32) {
    %c0_i32 = arith.constant 0 : i32
    %c0_i32_0 = arith.constant 0 : i32
    %c0_i32_1 = arith.constant 0 : i32
    %c0_i32_2 = arith.constant 0 : i32
    return %c0_i32, %c0_i32_0, %c0_i32_1 : i32, i32, i32
  }
  func.func @transform_2(%arg0: i32) -> (i32, i32) {
    %c0_i32 = arith.constant 0 : i32
    %c0_i32_0 = arith.constant 0 : i32
    %c0_i32_1 = arith.constant 0 : i32
    return %c0_i32, %c0_i32_0 : i32, i32
  }
  func.func @transform_3(%arg0: i32) -> (i32, i32) {
    %c0_i32 = arith.constant 0 : i32
    %c0_i32_0 = arith.constant 0 : i32
    return %arg0, %c0_i32 : i32, i32
  }
}

</mosaic_0001>

<bundles_post_ra>
// kernel: portfolio_forward.1
= control target key start
LH: loop header
LB: loop body
LE: loop exit
PB: predicated region body
PF: predicated region fallthrough
CT: control target
= control target key end

     0   :  { %8 = vsyncpa [#allocation3], 0  ;;  %s1460_s0 = inlined_call_operand.hbm [shape: f32[32,128], index: 0, kind: input, shape index: {}]   ;;  %s1461_s1 = inlined_call_operand.hbm [shape: f32[3,128,128], index: 1, kind: input, shape index: {}]   ;;  %s1462_s2 = inlined_call_operand.hbm [shape: f32[8,128], index: 2, kind: input, shape index: {}]   ;;  %s1463_s3 = inlined_call_operand.hbm [shape: f32[32,128], index: 3, kind: output, shape index: {}]  }
   0x1   :  { %10 = vsyncpa [#allocation3 + $0x1], 0 }
   0x2   :  { %11 = vsyncpa [#allocation6], 0 }
   0x3   :  { %12 = vsyncpa [#allocation4], 0 }
   0x4   :  { %14 = vsyncpa [#allocation4 + $0x1], 0  ;;  %s1201_s12 = smov 0   ;;  %s1203_s13 = smov 0  }
   0x5   :  { %s1205_s14 = smov 0   ;;  %s1207_s15 = smov 0  }
   0x6 LB: > { %s1222_s16 = sadd.s32 4294967295, %s1170_s15   ;;  %s683_s17 = sadd.s32 4294967294, %s1170_s15   ;;  %s1170_s15 = sphi %s1207_s15, %s1482_s15   ;;  %s1166_s14 = sphi %s1205_s14, %s1481_s14   ;;  %s1162_s13 = sphi %s1203_s13, %s1480_s13   ;;  %s1158_s12 = sphi %s1201_s12, %s1479_s12  }
   0x7   : > { %p40_p0 = scmp.ne.s32.totalorder %s1162_s13, %s1158_s12  ;;  %p1464_p1 = scmp.eq.s32.totalorder %s1222_s16, 0 }
   0x8   : > { %p112_p3 = scmp.eq.s32.totalorder %s683_s17, 3  ;;  %p684_p5 = scmp.ge.s32.totalorder %s1170_s15, 1 }
   0x9   : > { %p1231_p4 = por %p1464_p1, %p40_p0  ;;  %p119_p7 = scmp.lt.s32.totalorder %s1170_s15, 5 }
   0xa   : > { %p1236_p6 = por %p112_p3, %p40_p0  ;;  %s1172_s21 = smov [#allocation5]  }
   0xb   : > { %s1467_s18 = scalar_select %p1231_p4, 1, 0 }
   0xc   : > { %s1468_s19 = scalar_select %p1236_p6, 1, 0 }
   0xd   : > { %p1241_p8 = pnand %p684_p5, %p119_p7  ;;  %s131_s22 = sshll.u32 %s1172_s21, 4  ;;  %s132_s22 = int_to_ptr.vmem [resolvable:$true] %s131_s22 }
   0xe   : > { %s1173_s24 = smov [#allocation7]   ;;  %s1014_s28 = scalar_lea.hbm %s1461_s1, 6144 }
   0xf   : > { %s1469_s20 = scalar_select %p1241_p8, 1, 0 }
  0x10   : > { %p944_p9 = pneg %p1241_p8  ;;  %s145_s25 = sshll.u32 %s1173_s24, 4  ;;  %s1253_s25 = int_to_ptr.vmem [resolvable:$true] %s145_s25 }
  0x11   : > { %p1015_p11 = scmp.ne.s32.totalorder %s1461_s1, %s1014_s28  ;;  %p1021_p3 = scmp.lt.u32.totalorder %s1014_s28, %s1461_s1 }
  0x12   : > { %p1249_p10 = pnand %p944_p9, %p1464_p1 }
  0x14   : > { %p1016_p12 = pneg %p1249_p10 }
  0x16   : > { %p1017_p13 = pnand %p1016_p12, %p1015_p11 }
  0x18   : > { %p1018_p0 = pneg %p1017_p13 }
  0x1a   : > { %p1023_p5 = pnand %p1021_p3, %p1018_p0 }
  0x1c   : > { %1026 = shalt.err (!%p1023_p5)
}
  0x1d   : > { %s1027_s6 = scalar_lea.vmem %s132_s22, 6144  ;;  %p1035_p2 = scmp.lt.s32.totalorder %s132_s22, %s132_s22 }
  0x1e   : > { %p1028_p7 = scmp.ne.s32.totalorder %s132_s22, %s1027_s6  ;;  %p1036_p6 = scmp.lt.s32.totalorder %s1027_s6, %s1027_s6 }
  0x20   : > { %p1030_p9 = pnand %p1028_p7, %p1016_p12  ;;  %p1037_p4 = por %p1036_p6, %p1035_p2 }
  0x22   : > { %p1031_p1 = pneg %p1030_p9 }
  0x24   : > { %p1038_p8 = pnand %p1037_p4, %p1031_p1 }
  0x26   : > { %1041 = shalt.err (!%p1038_p8)
}
  0x27   : > { %s1174_s7 = smov 128   ;;  %s1175_s8 = smov 8  }
  0x28   : > { %947 = dma.hbm_to_vmem [thread:$0]  (!%p1249_p10), %s1461_s1, 6144, %s132_s22, [#allocation6], %s1174_s7, %s1174_s7, %s1175_s8  }
  0x29   : > { %s1042_s21 = scalar_lea.hbm %s1462_s2, 128 }
  0x2a   : > { %p1043_p11 = scmp.ne.s32.totalorder %s1462_s2, %s1042_s21  ;;  %p1049_p4 = scmp.lt.u32.totalorder %s1042_s21, %s1462_s2 }
  0x2c   : > { %p1045_p1 = pnand %p1043_p11, %p1016_p12 }
  0x2e   : > { %p1046_p2 = pneg %p1045_p1 }
  0x30   : > { %p1051_p6 = pnand %p1049_p4, %p1046_p2 }
  0x32   : > { %1054 = shalt.err (!%p1051_p6)
}
  0x33   : > { %s1055_s22 = scalar_lea.vmem %s1253_s25, 128  ;;  %p1063_p3 = scmp.lt.s32.totalorder %s1253_s25, %s1253_s25 }
  0x34   : > { %p1056_p8 = scmp.ne.s32.totalorder %s1253_s25, %s1055_s22  ;;  %p1064_p5 = scmp.lt.s32.totalorder %s1055_s22, %s1055_s22 }
  0x36   : > { %p1058_p13 = pnand %p1056_p8, %p1016_p12  ;;  %p1065_p7 = por %p1064_p5, %p1063_p3 }
  0x38   : > { %p1059_p0 = pneg %p1058_p13 }
  0x3a   : > { %p1066_p9 = pnand %p1065_p7, %p1059_p0 }
  0x3c   : > { %1069 = shalt.err (!%p1066_p9)
}
  0x3d   : > { %950 = dma.hbm_to_vmem [thread:$0]  (!%p1249_p10), %s1462_s2, 128, %s1253_s25, [#allocation6]  }
  0x3e   : > { %s1303_s4 = sadd.s32 1, %s1170_s15   ;;  %s27_s23 = sadd.s32 1, %s1166_s14 }
  0x3f   : > { %s24_s5 = ssub.s32 %s1170_s15, %s1303_s4  ;;  %p34_p12 = scmp.ne.s32.totalorder %s1166_s14, %s1162_s13 }
  0x40   : > { %p25_p11 = scmp.eq.s32.totalorder %s24_s5, 0  ;;  %p35_p1 = scmp.eq.s32.totalorder %s1170_s15, 0 }
  0x41   : > { %p1471_p2 = scmp.eq.s32.totalorder %s1222_s16, 3  ;;  %p961_p6 = scmp.lt.s32.totalorder %s1170_s15, 4 }
  0x42   : > { %s1319_s7 = scalar_select %p25_p11, %s1166_s14, %s27_s23  }
  0x43   : > { %p1313_p4 = por %p1471_p2, %p34_p12  ;;  %p36_p8 = por %p35_p1, %p34_p12 }
  0x44   : > { %s156_s8 = sand.u32 1, %s1166_s14   ;;  %s689_s25 = sshll.u32 %s1170_s15, 7 }
  0x45   : > { %s688_s9 = sshll.u32 %s156_s8, 3  ;;  %s1326_s17 = scalar_lea.hbm %s1460_s0, %s689_s25 }
  0x46   : > { %s160_s21 = scalar_lea.vmem [#allocation2], %s688_s9  ;;  %p1330_p10 = pnand %p961_p6, %p36_p8 }
  0x47   : > { %s167_s24 = sshll.u32 %s160_s21, 4  ;;  %s157_s27 = scalar_lea.sflag [#allocation3], %s156_s8  ;;  %s1328_s24 = int_to_ptr.vmem [resolvable:$true] %s167_s24 }
  0x48   : > { %s1070_s28 = scalar_lea.hbm %s1326_s17, 128  ;;  %p1072_p0 = pneg %p1330_p10 }
  0x49   : > { %p1071_p13 = scmp.ne.s32.totalorder %s1326_s17, %s1070_s28  ;;  %s1075_s30 = scalar_lea.hbm %s1460_s0, 512 }
  0x4a   : > { %p1076_p7 = scmp.lt.u32.totalorder %s1326_s17, %s1460_s0  ;;  %p1077_p9 = scmp.lt.u32.totalorder %s1075_s30, %s1070_s28 }
  0x4b   : > { %p1073_p3 = pnand %p1072_p0, %p1071_p13  ;;  %p1079_p11 = scmp.lt.u32.totalorder %s1070_s28, %s1326_s17 }
  0x4c   : > { %p1078_p12 = por %p1077_p9, %p1076_p7 }
  0x4d   : > { %p1074_p5 = pneg %p1073_p3 }
  0x4e   : > { %p1080_p1 = por %p1079_p11, %p1078_p12 }
  0x50   : > { %p1081_p2 = pnand %p1080_p1, %p1074_p5 }
  0x52   : > { %1084 = shalt.err (!%p1081_p2)
}
  0x53   : > { %s1085_s8 = scalar_lea.vmem %s1328_s24, 128  ;;  %s1176_s9 = smov [#allocation2]  }
  0x54   : > { %p1086_p6 = scmp.ne.s32.totalorder %s1328_s24, %s1085_s8  ;;  %s1090_s25 = sshll.u32 %s1176_s9, 4  ;;  %s1091_s25 = int_to_ptr.vmem [resolvable:$false] %s1090_s25 }
  0x55   : > { %s1092_s10 = scalar_lea.vmem %s1091_s25, 256  ;;  %p1093_p3 = scmp.lt.s32.totalorder %s1328_s24, %s1091_s25 }
  0x56   : > { %p1088_p8 = pnand %p1086_p6, %p1072_p0  ;;  %p1094_p7 = scmp.lt.s32.totalorder %s1092_s10, %s1085_s8 }
  0x58   : > { %p1089_p13 = pneg %p1088_p8  ;;  %p1095_p9 = por %p1094_p7, %p1093_p3 }
  0x5a   : > { %p1096_p12 = pnand %p1095_p9, %p1089_p13 }
  0x5c   : > { %1099 = shalt.err (!%p1096_p12)
}
  0x5d   : > { %954 = dma.hbm_to_vmem [thread:$0]  (!%p1330_p10), %s1326_s17, 128, %s1328_s24, %s157_s27  }
  0x5e   : > { %p1474_p5 = scmp.ne.s32.totalorder %s1469_s20, 0 }
  0x5f   : > { %s1362_s11 = sand.u32 (!%p1474_p5), 1, %s1162_s13   ;;  %p1475_p0 = scmp.ne.s32.totalorder (!%p1474_p5), %s1467_s18, 0 }
  0x60   : > { %176 = sbr.rel (%p1474_p5) target bundleno = 988 (0x3dc), region = 32  ;;  %s691_s21 = sshll.u32 (!%p1474_p5), %s1362_s11, 3 }
  0x61   : > { %s179_s28 = scalar_lea.sflag (!%p1474_p5), [#allocation3], %s1362_s11  ;;  %s1368_s22 = scalar_lea.vmem (!%p1474_p5), [#allocation2], %s691_s21 }
  0x67   : > { %1145 = dma.done.wait (%p1475_p0), %s179_s28, 128  }
  0x68   : > { %1147 = vsyncadd (%p1475_p0), %s179_s28, 4294967168  ;;  %p1476_p10 = scmp.eq.s32.totalorder %s1222_s16, 0 }
  0x6a   : > { %1149 = dma.done.wait (%p1476_p10), [#allocation6], 6272   ;;  %p1477_p11 = pmov %p1476_p10 }
  0x6b   : > { %v1177_v0 = vmov 0.0|0.0   ;;  %vm1178_vm0 = vmmov 0   ;;  %v1179_v1 = vmov 0.0   ;;  %v214_v2 = vld [vmem:[#allocation5] sm:$0xff]  ;;  %v215_v3 = vld [vmem:[#allocation5 + $0x8] sm:$0xff]  ;;  %v216_v4 = vld [vmem:[#allocation5 + $0x10] sm:$0xff] }
  0x6c   : > { %1151 = vsyncadd (%p1477_p11), [#allocation6], 4294961024  ;;  %860 = vmatprep.subr.bf16.mxu0 %v1177_v0  ;;  %787 = vmatprep.mubr.msk.f32.mxu0 %vm1178_vm0, %v1179_v1  ;;  %v861_v5 = vpack.c.bf16 %v215_v3, %v214_v2  ;;  %v217_v6 = vld [vmem:[#allocation5 + $0x18] sm:$0xff]  ;;  %v218_v8 = vld [vmem:[#allocation5 + $0x20] sm:$0xff]  ;;  %s701_s18 = sshll.u32 %s1222_s16, 7  ;;  %s212_s20 = scalar_lea.vmem [#allocation8], %s691_s21 }
  0x6d   : > { %884 = vmatprep.subr.bf16.mxu1 %v1177_v0  ;;  %822 = vmatprep.mubr.msk.f32.mxu1 %vm1178_vm0, %v1179_v1  ;;  %v864_v7 = vpack.c.bf16 %v217_v6, %v216_v4  ;;  %v219_v9 = vld [vmem:[#allocation5 + $0x28] sm:$0xff]  ;;  %v220_v11 = vld [vmem:[#allocation5 + $0x30] sm:$0xff]  ;;  %v221_v12 = vld [vmem:[#allocation5 + $0x38] sm:$0xff]  ;;  %s594_s17 = sshll.u32 %s212_s20, 4  ;;  %s1417_s27 = scalar_lea.hbm %s1463_s3, %s701_s18  ;;  %s1419_s17 = int_to_ptr.vmem [resolvable:$true] %s594_s17 }
  0x6e   : > { %862 = vmatpush3.bf16.msra.mxu0 %v861_v5  ;;  %v867_v10 = vpack.c.bf16 %v219_v9, %v218_v8  ;;  %v870_v13 = vpack.c.bf16 %v221_v12, %v220_v11  ;;  %v222_v14 = vld [vmem:[#allocation5 + $0x40] sm:$0xff]  ;;  %v223_v15 = vld [vmem:[#allocation5 + $0x48] sm:$0xff]  ;;  %v224_v17 = vld [vmem:[#allocation5 + $0x50] sm:$0xff]  ;;  %s581_s29 = scalar_lea.sflag [#allocation4], %s1362_s11  ;;  %s1100_s30 = scalar_lea.vmem %s1419_s17, 128 }
  0x6f   : > { %863 = vmatprep.subr.bf16.mxu0 %v1177_v0  ;;  %v873_v16 = vpack.c.bf16 %v223_v15, %v222_v14  ;;  %v225_v18 = vld [vmem:[#allocation5 + $0x58] sm:$0xff]  ;;  %v226_v20 = vld [vmem:[#allocation5 + $0x60] sm:$0xff]  ;;  %v227_v21 = vld [vmem:[#allocation5 + $0x68] sm:$0xff]  ;;  %p1101_p1 = scmp.ne.s32.totalorder %s1419_s17, %s1100_s30  ;;  %s1180_s16 = smov [#allocation8]  }
  0x70   : > { %v876_v19 = vpack.c.bf16 %v225_v18, %v224_v17  ;;  %v879_v22 = vpack.c.bf16 %v227_v21, %v226_v20  ;;  %v228_v23 = vld [vmem:[#allocation5 + $0x70] sm:$0xff]  ;;  %v229_v24 = vld [vmem:[#allocation5 + $0x78] sm:$0xff]  ;;  %v334_v27 = vld [vmem:[#allocation5 + $0x80] sm:$0xff]  ;;  %s1104_s23 = sshll.u32 %s1180_s16, 4  ;;  %s1105_s23 = int_to_ptr.vmem [resolvable:$false] %s1104_s23 }
  0x71   : > { %v882_v25 = vpack.c.bf16 %v229_v24, %v228_v23  ;;  %v213_v26 = vld [vmem:[%s1368_s22] sm:$0xff]  ;;  %v335_v28 = vld [vmem:[#allocation5 + $0x88] sm:$0xff]  ;;  %v338_v33 = vld [vmem:[#allocation5 + $0xa0] sm:$0xff]  ;;  %p1102_p2 = pnand %p1101_p1, %p1313_p4  ;;  %s1106_s5 = scalar_lea.vmem %s1105_s23, 256 }
  0x72   : > { %865 = vmatpush3.bf16.msra.mxu0 %v864_v7  ;;  %v885_v29 = vpack.c.bf16 %v335_v28, %v334_v27  ;;  %v336_v30 = vld [vmem:[#allocation5 + $0x90] sm:$0xff]  ;;  %v337_v31 = vld [vmem:[#allocation5 + $0x98] sm:$0xff]  ;;  %v339_v34 = vld [vmem:[#allocation5 + $0xa8] sm:$0xff]  ;;  %v321_v7 = vlaneseq  ;;  %p1107_p8 = scmp.lt.s32.totalorder %s1419_s17, %s1105_s23  ;;  %p1108_p13 = scmp.lt.s32.totalorder %s1106_s5, %s1100_s30 }
  0x73   : > { %866 = vmatprep.subr.bf16.mxu0 %v1177_v0  ;;  %v888_v32 = vpack.c.bf16 %v337_v31, %v336_v30  ;;  %v891_v35 = vpack.c.bf16 %v339_v34, %v338_v33  ;;  %v340_v36 = vld [vmem:[#allocation5 + $0xb0] sm:$0xff]  ;;  %v341_v37 = vld [vmem:[#allocation5 + $0xb8] sm:$0xff]  ;;  %v342_v39 = vld [vmem:[#allocation5 + $0xc0] sm:$0xff]  ;;  %p1103_p6 = pneg %p1102_p2 }
  0x74   : > { %886 = vmatpush3.bf16.msra.mxu1 %v885_v29  ;;  %v894_v38 = vpack.c.bf16 %v341_v37, %v340_v36  ;;  %v343_v40 = vld [vmem:[#allocation5 + $0xc8] sm:$0xff]  ;;  %v344_v42 = vld [vmem:[#allocation5 + $0xd0] sm:$0xff]  ;;  %v345_v43 = vld [vmem:[#allocation5 + $0xd8] sm:$0xff]  ;;  %v322_v8 = vshrl.u32 %v321_v7, 7  ;;  %p1109_p3 = por %p1108_p13, %p1107_p8 }
  0x75   : > { %887 = vmatprep.subr.bf16.mxu1 %v1177_v0  ;;  %v897_v41 = vpack.c.bf16 %v343_v40, %v342_v39  ;;  %v900_v44 = vpack.c.bf16 %v345_v43, %v344_v42  ;;  %v346_v45 = vld [vmem:[#allocation5 + $0xe0] sm:$0xff]  ;;  %v347_v46 = vld [vmem:[#allocation5 + $0xe8] sm:$0xff]  ;;  %v348_v48 = vld [vmem:[#allocation5 + $0xf0] sm:$0xff] }
  0x76   : > { %868 = vmatpush3.bf16.msra.mxu0 %v867_v10  ;;  %v903_v47 = vpack.c.bf16 %v347_v46, %v346_v45  ;;  %v349_v49 = vld [vmem:[#allocation5 + $0xf8] sm:$0xff]  ;;  %v300_v9 = vld [vmem:[#allocation7] sm:$0x1]  ;;  %v1399_v10 = vsub.s32 0, %v322_v8  ;;  %v695_v14 = vld [vmem:[#allocation7 + $0x1] ss:$0 sm:$0xff]  ;;  %p1110_p7 = pnand %p1109_p3, %p1103_p6 }
  0x77   : > { %869 = vmatprep.subr.bf16.mxu0 %v1177_v0  ;;  %v906_v50 = vpack.c.bf16 %v349_v49, %v348_v48  ;;  %v455_v20 = vld [vmem:[#allocation5 + $0x108] sm:$0xff]  ;;  %v457_v23 = vld [vmem:[#allocation5 + $0x118] sm:$0xff]  ;;  %v460_v28 = vld [vmem:[#allocation5 + $0x130] sm:$0xff] }
  0x78   : > { %889 = vmatpush3.bf16.msra.mxu1 %v888_v32  ;;  %v461_v29 = vld [vmem:[#allocation5 + $0x138] sm:$0xff]  ;;  %v462_v31 = vld [vmem:[#allocation5 + $0x140] sm:$0xff]  ;;  %v463_v32 = vld [vmem:[#allocation5 + $0x148] sm:$0xff] }
  0x79   : > { %890 = vmatprep.subr.bf16.mxu1 %v1177_v0  ;;  %v918_v30 = vpack.c.bf16 %v461_v29, %v460_v28  ;;  %v921_v33 = vpack.c.bf16 %v463_v32, %v462_v31  ;;  %v464_v34 = vld [vmem:[#allocation5 + $0x150] sm:$0xff]  ;;  %v466_v37 = vld [vmem:[#allocation5 + $0x160] sm:$0xff] }
  0x7a   : > { %871 = vmatpush3.bf16.msra.mxu0 %v870_v13  ;;  %v468_v40 = vld [vmem:[#allocation5 + $0x170] sm:$0xff]  ;;  %v697_v31 = vld [vmem:[#allocation7 + $0x5] ss:$0 sm:$0xff] }
  0x7b   : > { %872 = vmatprep.subr.bf16.mxu0 %v1177_v0 }
  0x7c   : > { %892 = vmatpush3.bf16.msra.mxu1 %v891_v35  ;;  %v465_v35 = vld [vmem:[#allocation5 + $0x158] sm:$0xff] }
  0x7d   : > { %893 = vmatprep.subr.bf16.mxu1 %v1177_v0  ;;  %v924_v36 = vpack.c.bf16 %v465_v35, %v464_v34 }
  0x7e   : > { %874 = vmatpush3.bf16.msra.mxu0 %v873_v16 }
  0x7f   : > { %875 = vmatprep.subr.bf16.mxu0 %v1177_v0 }
  0x80   : > { %895 = vmatpush3.bf16.msra.mxu1 %v894_v38  ;;  %v467_v38 = vld [vmem:[#allocation5 + $0x168] sm:$0xff] }
  0x81   : > { %896 = vmatprep.subr.bf16.mxu1 %v1177_v0  ;;  %v927_v39 = vpack.c.bf16 %v467_v38, %v466_v37 }
  0x82   : > { %877 = vmatpush3.bf16.msra.mxu0 %v876_v19  ;;  %v454_v19 = vld [vmem:[#allocation5 + $0x100] sm:$0xff] }
  0x83   : > { %878 = vmatprep.subr.bf16.mxu0 %v1177_v0  ;;  %v909_v21 = vpack.c.bf16 %v455_v20, %v454_v19 }
  0x84   : > { %898 = vmatpush3.bf16.msra.mxu1 %v897_v41  ;;  %v469_v41 = vld [vmem:[#allocation5 + $0x178] sm:$0xff] }
  0x85   : > { %899 = vmatprep.subr.bf16.mxu1 %v1177_v0  ;;  %v930_v42 = vpack.c.bf16 %v469_v41, %v468_v40 }
  0x86   : > { %880 = vmatpush3.bf16.msra.mxu0 %v879_v22  ;;  %v456_v22 = vld [vmem:[#allocation5 + $0x110] sm:$0xff] }
  0x87   : > { %881 = vmatprep.subr.bf16.mxu0 %v1177_v0  ;;  %v912_v24 = vpack.c.bf16 %v457_v23, %v456_v22 }
  0x88   : > { %901 = vmatpush3.bf16.msra.mxu1 %v900_v44 }
  0x89   : > { %902 = vmatprep.subr.bf16.mxu1 %v1177_v0 }
  0x8a   : > { %883 = vmatpush3.bf16.msra.mxu0 %v882_v25  ;;  %v458_v25 = vld [vmem:[#allocation5 + $0x120] sm:$0xff] }
  0x8b   : > { %908 = vmatprep.subr.bf16.mxu0 %v1177_v0 }
  0x8c   : > { %904 = vmatpush3.bf16.msra.mxu1 %v903_v47 }
  0x8d   : > { %788 = vmatmul.mubr.f32.vlgmr.msra.gmra.mrb[0].mxu0 %v213_v26  ;;  %905 = vmatprep.subr.bf16.mxu1 %v1177_v0  ;;  %v459_v26 = vld [vmem:[#allocation5 + $0x128] sm:$0xff] }
  0x8e   : > { %857 = vmatprep.mubr.msk.f32.mxu0 %vm1178_vm0, %v1179_v1  ;;  %910 = vmatpush3.bf16.msra.mxu0 %v909_v21  ;;  %v915_v27 = vpack.c.bf16 %v459_v26, %v458_v25 }
  0x8f   : > { %911 = vmatprep.subr.bf16.mxu0 %v1177_v0 }
  0x90   : > { %907 = vmatpush3.bf16.msra.mxu1 %v906_v50 }
  0x92   : > { %913 = vmatpush3.bf16.msra.mxu0 %v912_v24 }
  0x93   : > { %914 = vmatprep.subr.bf16.mxu0 %v1177_v0 }
  0x96   : > { %916 = vmatpush3.bf16.msra.mxu0 %v915_v27  ;;  %v540_v27 = vld [vmem:[#allocation7 + $0x4] sm:$0x1] }
  0x97   : > { %917 = vmatprep.subr.bf16.mxu0 %v1177_v0 }
  0x9a   : > { %919 = vmatpush3.bf16.msra.mxu0 %v918_v30 }
  0x9b   : > { %920 = vmatprep.subr.bf16.mxu0 %v1177_v0 }
  0x9e   : > { %922 = vmatpush3.bf16.msra.mxu0 %v921_v33 }
  0x9f   : > { %923 = vmatprep.subr.bf16.mxu0 %v1177_v0 }
  0xa2   : > { %925 = vmatpush3.bf16.msra.mxu0 %v924_v36 }
  0xa3   : > { %926 = vmatprep.subr.bf16.mxu0 %v1177_v0 }
  0xa6   : > { %928 = vmatpush3.bf16.msra.mxu0 %v927_v39 }
  0xa7   : > { %929 = vmatprep.subr.bf16.mxu0 %v1177_v0 }
  0xaa   : > { %931 = vmatpush3.bf16.msra.mxu0 %v930_v42 }
 0x160   : > { %v296_v51 = vpop.f32.mrb[0].mxu0 }
 0x161   : > { %v302_v52 = vrot.slane %v296_v51, 4  ;;  %v789_v53 = vpop.f32.mrb[1].mxu0 }
 0x163   : > { %v303_v54 = vadd.f32 %v302_v52, %v296_v51 }
 0x165   : > { %v304_v55 = vrot.slane %v303_v54, 2 }
 0x167   : > { %v305_v56 = vadd.f32 %v304_v55, %v303_v54 }
 0x169   : > { %v306_v57 = vrot.slane %v305_v56, 1 }
 0x16b   : > { %v307_v58 = vadd.f32 %v306_v57, %v305_v56 }
 0x16d   : > { %v308_v59 = vmul.f32 0.125, %v307_v58 }
 0x16f   : > { %v309_v60 = vsub.f32 %v296_v51, %v308_v59 }
 0x171   : > { %v310_v61 = vmul.f32 %v309_v60, %v309_v60 }
 0x173   : > { %v311_v62 = vrot.slane %v310_v61, 4 }
 0x175   : > { %v312_v63 = vadd.f32 %v311_v62, %v310_v61  ;;  %v420_v61 = vld [vmem:[#allocation7 + $0x2] sm:$0x1] }
 0x177   : > { %v313_v1 = vrot.slane %v312_v63, 2 }
 0x179   : > { %v314_v2 = vadd.f32 %v313_v1, %v312_v63 }
 0x17b   : > { %v315_v3 = vrot.slane %v314_v2, 1 }
 0x17d   : > { %v316_v4 = vadd.f32 %v315_v3, %v314_v2  ;;  %v696_v2 = vld [vmem:[#allocation7 + $0x3] ss:$0 sm:$0xff] }
 0x17f   : > { %v317_v5 = vmul.f32 0.125, %v316_v4 }
 0x181   : > { %v318_v6 = vadd.f32 1e-05, %v317_v5 }
 0x183   : > { %1004 = vrsqrt.f32 %v318_v6 }
 0x18d   : > { %v1005_v11 = vpop.eup %1004 }
 0x18e   : > { %v320_v12 = vmul.f32 %v1005_v11, %v300_v9 }
 0x190   : > { %v324_v13 = vrot.slane %v320_v12, %v1399_v10 }
 0x192   : > { %v325_v15 = vmul.f32 %v324_v13, %v309_v60 }
 0x194   : > { %v330_v16 = vadd.f32 %v695_v14, %v325_v15 }
 0x196   : > { %v331_v17 = vmul.f32 0.01, %v330_v16 }
 0x198   : > { %v332_v18 = vmax.f32 %v330_v16, %v331_v17 }
 0x19a   : > { %823 = vmatmul.mubr.f32.vlgmr.msra.gmra.mrb[0].mxu1 %v332_v18 }
 0x26d   : > { %v416_v43 = vpop.f32.mrb[0].mxu1 }
 0x26e   : > { %v422_v44 = vrot.slane %v416_v43, 4  ;;  %v824_v45 = vpop.f32.mrb[1].mxu1 }
 0x270   : > { %v423_v46 = vadd.f32 %v422_v44, %v416_v43 }
 0x272   : > { %v424_v47 = vrot.slane %v423_v46, 2 }
 0x274   : > { %v425_v48 = vadd.f32 %v424_v47, %v423_v46 }
 0x276   : > { %v426_v49 = vrot.slane %v425_v48, 1 }
 0x278   : > { %v427_v50 = vadd.f32 %v426_v49, %v425_v48 }
 0x27a   : > { %v428_v51 = vmul.f32 0.125, %v427_v50 }
 0x27c   : > { %v429_v52 = vsub.f32 %v416_v43, %v428_v51 }
 0x27e   : > { %v430_v53 = vmul.f32 %v429_v52, %v429_v52 }
 0x280   : > { %v431_v54 = vrot.slane %v430_v53, 4 }
 0x282   : > { %v432_v55 = vadd.f32 %v431_v54, %v430_v53 }
 0x284   : > { %v433_v56 = vrot.slane %v432_v55, 2 }
 0x286   : > { %v434_v57 = vadd.f32 %v433_v56, %v432_v55 }
 0x288   : > { %v435_v0 = vrot.slane %v434_v57, 1 }
 0x28a   : > { %v436_v58 = vadd.f32 %v435_v0, %v434_v57 }
 0x28c   : > { %v437_v59 = vmul.f32 0.125, %v436_v58 }
 0x28e   : > { %v438_v60 = vadd.f32 1e-05, %v437_v59 }
 0x290   : > { %1006 = vrsqrt.f32 %v438_v60 }
 0x29a   : > { %v1007_v62 = vpop.eup %1006 }
 0x29b   : > { %v440_v63 = vmul.f32 %v1007_v62, %v420_v61 }
 0x29d   : > { %v444_v1 = vrot.slane %v440_v63, %v1399_v10 }
 0x29f   : > { %v445_v3 = vmul.f32 %v444_v1, %v429_v52 }
 0x2a1   : > { %v450_v4 = vadd.f32 %v696_v2, %v445_v3 }
 0x2a3   : > { %v451_v5 = vmul.f32 0.01, %v450_v4 }
 0x2a5   : > { %v452_v6 = vmax.f32 %v450_v4, %v451_v5 }
 0x2a7   : > { %858 = vmatmul.mubr.f32.vlgmr.msra.gmra.mrb[2].mxu0 %v452_v6 }
 0x37a   : > { %v536_v7 = vpop.f32.mrb[2].mxu0 }
 0x37b   : > { %v542_v8 = vrot.slane %v536_v7, 4  ;;  %v859_v9 = vpop.f32.mrb[3].mxu0 }
 0x37d   : > { %v543_v11 = vadd.f32 %v542_v8, %v536_v7 }
 0x37f   : > { %v544_v12 = vrot.slane %v543_v11, 2 }
 0x381   : > { %v545_v13 = vadd.f32 %v544_v12, %v543_v11 }
 0x383   : > { %v546_v14 = vrot.slane %v545_v13, 1 }
 0x385   : > { %v547_v15 = vadd.f32 %v546_v14, %v545_v13 }
 0x387   : > { %v548_v16 = vmul.f32 0.125, %v547_v15 }
 0x389   : > { %v549_v17 = vsub.f32 %v536_v7, %v548_v16 }
 0x38b   : > { %v550_v18 = vmul.f32 %v549_v17, %v549_v17 }
 0x38d   : > { %v551_v19 = vrot.slane %v550_v18, 4 }
 0x38f   : > { %v552_v20 = vadd.f32 %v551_v19, %v550_v18 }
 0x391   : > { %v553_v21 = vrot.slane %v552_v20, 2 }
 0x393   : > { %v554_v22 = vadd.f32 %v553_v21, %v552_v20 }
 0x395   : > { %v555_v23 = vrot.slane %v554_v22, 1 }
 0x397   : > { %v556_v24 = vadd.f32 %v555_v23, %v554_v22 }
 0x399   : > { %v557_v25 = vmul.f32 0.125, %v556_v24 }
 0x39b   : > { %v558_v26 = vadd.f32 1e-05, %v557_v25 }
 0x39d   : > { %1008 = vrsqrt.f32 %v558_v26 }
 0x3a7   : > { %v1009_v28 = vpop.eup %1008 }
 0x3a8   : > { %v560_v29 = vmul.f32 %v1009_v28, %v540_v27 }
 0x3aa   : > { %v564_v30 = vrot.slane %v560_v29, %v1399_v10 }
 0x3ac   : > { %v565_v32 = vmul.f32 %v564_v30, %v549_v17 }
 0x3ae   : > { %v570_v33 = vadd.f32 %v697_v31, %v565_v32 }
 0x3b0   : > { %v698_v34 = vmul.f32 -1.442695, %v570_v33 }
 0x3b2   : > { %1010 = vpow2.f32 %v698_v34 }
 0x3bc   : > { %v1011_v35 = vpop.eup %1010 }
 0x3bd   : > { %v574_v36 = vadd.f32 1.0, %v1011_v35 }
 0x3bf   : > { %1012 = vrcp.f32 %v574_v36 }
 0x3c9   : > { %v1013_v37 = vpop.eup %1012 }
 0x3ca   : > { %v699_v38 = vadd.f32 -0.5, %v1013_v37 }
 0x3cc   : > { %v578_v39 = vmul.f32 0.1, %v699_v38 }
 0x3ce   : > { %579 = vst [vmem:[%s212_s20] sm:$0xff] %v578_v39 }
 0x3cf   : > { %1113 = shalt.err (!%p1110_p7)
}
 0x3d0   : > { %s1114_s8 = scalar_lea.hbm %s1417_s27, 128  ;;  %s1118_s10 = scalar_lea.hbm %s1463_s3, 512 }
 0x3d1   : > { %p1115_p9 = scmp.ne.s32.totalorder %s1417_s27, %s1114_s8  ;;  %p1119_p0 = scmp.lt.u32.totalorder %s1417_s27, %s1463_s3 }
 0x3d2   : > { %p1120_p10 = scmp.lt.u32.totalorder %s1118_s10, %s1114_s8  ;;  %p1122_p1 = scmp.lt.u32.totalorder %s1114_s8, %s1417_s27 }
 0x3d3   : > { %p1116_p12 = pnand %p1115_p9, %p1313_p4 }
 0x3d4   : > { %p1121_p11 = por %p1120_p10, %p1119_p0 }
 0x3d5   : > { %p1117_p5 = pneg %p1116_p12 }
 0x3d6   : > { %p1123_p2 = por %p1122_p1, %p1121_p11 }
 0x3d8   : > { %p1124_p6 = pnand %p1123_p2, %p1117_p5 }
 0x3da   : > { %1127 = shalt.err (!%p1124_p6)
}
 0x3db   : > { %942 = dma.vmem_to_hbm [thread:$0]  (%p1313_p4), %s1419_s17, 128, %s1417_s27, %s581_s29  }
 0x3dc PF: > { %p964_p8 = scmp.ge.s32.totalorder %s1170_s15, 2  ;;  %s606_s28 = sand.u32 1, %s1158_s12  }
 0x3dd   : > { %p1478_p13 = scmp.ne.s32.totalorder %s1468_s19, 0  ;;  %s607_s22 = scalar_lea.sflag [#allocation4], %s606_s28 }
 0x3df   : > { %p956_p3 = pnand %p964_p8, %p1478_p13 }
 0x3e1   : > { %1153 = dma.done.wait (!%p956_p3), %s607_s22, 128  }
 0x3e2   : > { %1155 = vsyncadd (!%p956_p3), %s607_s22, 4294967168  ;;  %p17_p7 = scmp.ge.s32.totalorder %s1303_s4, 6   ;;  %s1479_s12 = smov %s1162_s13 }
 0x3e3   : > { %s1480_s13 = smov %s1166_s14  ;;  %s1481_s14 = smov %s1319_s7 }
 0x3e4   : > { %s1482_s15 = smov %s1303_s4  ;;  %19 = sbr.rel (!%p17_p7) target bundleno = 6 (0x6), region = 87 }
 0x3eb   :  { %612 = vsyncpa [#allocation3], 1 }
 0x3ec   :  { %614 = vsyncpa [#allocation3 + $0x1], 1 }
 0x3ed   :  { %615 = vsyncpa [#allocation6], 1 }
 0x3ee   :  { %616 = vsyncpa [#allocation4], 1 }
 0x3ef   :  { %618 = vsyncpa [#allocation4 + $0x1], 1 }

</bundles_post_ra>
